<compile_context>
chip_gen: v5e
topology: v5e:2x2
jax: 0.10.0
libtpu: 0.0.40
codegen_flags: <defaults>
</compile_context>

<pallas_src>
import functools

import jax
import jax.numpy as jnp
from jax.experimental import pallas as pl
from jax.experimental.pallas import tpu as pltpu


# ----------------------------- init helpers (plain JAX glue) -----------------

def _standardize(kernel):
    # 2-D case of the PyTorch _standardize: per-row (axis=1) unbiased var/mean.
    mean = jnp.mean(kernel, axis=1, keepdims=True)
    var = jnp.var(kernel, axis=1, ddof=1, keepdims=True)
    return (kernel - mean) / jnp.sqrt(var + 1e-6)


def he_orthogonal_init(key, shape):
    """Deterministic He-orthogonal init matching the PyTorch recipe.

    shape = (out_features, in_features); fan_in = in_features.
    """
    n_rows, n_cols = shape
    a = jax.random.normal(key, (max(n_rows, n_cols), min(n_rows, n_cols)),
                          dtype=jnp.float32)
    q, r = jnp.linalg.qr(a)
    # Make the decomposition unique (same trick torch.nn.init.orthogonal_ uses).
    q = q * jnp.sign(jnp.diagonal(r))[None, :]
    if n_rows < n_cols:
        q = q.T
    w = _standardize(q[:n_rows, :n_cols])
    return w * jnp.sqrt(1.0 / n_cols)


# ----------------------------- small utils -----------------------------------

def _round_up(x, m):
    return ((x + m - 1) // m) * m


_VALID_ACTS = ("swish", "silu", "siqu", None)


# ----------------------------- Pallas kernel ---------------------------------

def _dense_kernel(x_ref, wt_ref, o_ref, *, activation):
    # x_ref : [tm, K]   streamed down the row axis (double-buffered by Pallas)
    # wt_ref: [K, tn]   resident (single-buffered) or streamed down N
    # o_ref : [tm, tn]
    y = jnp.dot(x_ref[...], wt_ref[...], preferred_element_type=jnp.float32)
    # Activation math stays in f32 (v5e VPU/EUP have no bf16 datapath).
    if activation in ("swish", "silu"):
        y = (y * jax.nn.sigmoid(y)) * (1.0 / 0.6)            # ScaledSiLU
    elif activation == "siqu":
        y = y * (y * jax.nn.sigmoid(y))                       # SiQU
    # None -> identity
    o_ref[...] = y.astype(o_ref.dtype)


# ----------------------------- weight prep (outside hot path) ----------------

def prepare_weight(weight, compute_dtype=None):
    """One-time weight prep (do this OUTSIDE the forward hot path).

    weight: [out_features, in_features] (PyTorch layout).
    Returns wt_padded: [in_features, N_pad] with N_pad a multiple of 128
    (zero-padded columns), already transposed for a plain x @ Wt MXU matmul,
    optionally pre-cast to `compute_dtype` (e.g. bf16) so the kernel never
    casts data it just DMA'd.  K is intentionally NOT padded.
    """
    out_f, k = weight.shape
    n_pad = _round_up(out_f, 128)
    dtype = compute_dtype if compute_dtype is not None else weight.dtype
    wt = jnp.zeros((k, n_pad), dtype=dtype)
    wt = wt.at[:, :out_f].set(weight.T.astype(dtype))
    return wt


# ----------------------------- tiling policy ----------------------------------

def _choose_tiles(n, k, n_pad, x_itemsize, w_itemsize, o_itemsize,
                  vmem_budget_bytes):
    # Keep the whole (N-padded, transposed) weight resident in VMEM if it fits
    # inside ~half the budget; otherwise stream lane-dense column tiles of it
    # (multiples of 128; 256+ preferred to fill the 256-wide MXU on v6e/v7x).
    tn = n_pad
    resident = k * tn * w_itemsize <= vmem_budget_bytes // 2
    if not resident:
        tn = 2048
        while tn > 128 and 2 * k * tn * w_itemsize > vmem_budget_bytes // 2:
            tn //= 2
    w_bytes = (1 if resident else 2) * k * tn * w_itemsize

    # Row tile: as big as fits (each grid step costs ~0.35us), multiple of 8,
    # but >=2 row steps when possible so v7x's two TensorCores both get work.
    tm = min(1024, _round_up(n, 8))
    if n > 8:
        tm = min(tm, _round_up((n + 1) // 2, 8))
    while tm > 8 and (w_bytes + 2 * tm * (k * x_itemsize + tn * o_itemsize)
                      > vmem_budget_bytes):
        tm = max(8, _round_up(tm // 2, 8))
    return tm, tn, resident


# ----------------------------- forward -----------------------------------------

def dense_forward(x, wt_padded, out_features, activation=None, out_dtype=None,
                  vmem_budget_bytes=24 * 1024 * 1024):
    """x: [n, in_features] (pre-cast to bf16 by the caller for the bf16 path);
    wt_padded: [in_features, N_pad] from prepare_weight()."""
    if isinstance(activation, str):
        activation = activation.lower()
    if activation not in _VALID_ACTS:
        raise NotImplementedError(
            "Activation function not implemented for GemNet (yet).")

    n, k = x.shape
    kw, n_pad = wt_padded.shape
    assert kw == k and out_features <= n_pad
    out_dtype = out_dtype if out_dtype is not None else x.dtype
    o_itemsize = jnp.dtype(out_dtype).itemsize

    tm, tn, resident = _choose_tiles(
        n, k, n_pad, x.dtype.itemsize, wt_padded.dtype.itemsize, o_itemsize,
        vmem_budget_bytes)
    grid = (pl.cdiv(n, tm), pl.cdiv(n_pad, tn))

    # Scoped-VMEM limit from the actual footprint (conservatively assume the
    # weight is double-buffered) + margin for compiler-internal scratch.
    vmem_limit = (2 * tm * k * x.dtype.itemsize
                  + 2 * k * tn * wt_padded.dtype.itemsize
                  + 2 * tm * tn * o_itemsize
                  + (4 << 20))
    vmem_limit = int(min(max(vmem_limit, 16 << 20), 48 << 20))

    cost = pl.CostEstimate(
        flops=2 * n * k * n_pad,
        transcendentals=(n * n_pad if activation is not None else 0),
        bytes_accessed=(n * k * x.dtype.itemsize
                        + k * n_pad * wt_padded.dtype.itemsize
                        + n * n_pad * o_itemsize))

    kernel = functools.partial(_dense_kernel, activation=activation)

    def run(weight_spec):
        return pl.pallas_call(
            kernel,
            out_shape=jax.ShapeDtypeStruct((n, n_pad), out_dtype),
            grid_spec=pltpu.PrefetchScalarGridSpec(
                num_scalar_prefetch=0,
                grid=grid,
                in_specs=[
                    # x streams down the row axis; K block == full array dim,
                    # so no K padding and no zero-pad copy of x is needed.
                    # Ragged last row block -> masked loads/stores.
                    pl.BlockSpec((tm, k), lambda i, j: (i, 0)),
                    weight_spec,
                ],
                out_specs=pl.BlockSpec((tm, tn), lambda i, j: (i, j)),
            ),
            compiler_params=pltpu.CompilerParams(
                dimension_semantics=("parallel", "parallel"),
                vmem_limit_bytes=vmem_limit),
            cost_estimate=cost,
        )(x, wt_padded)

    out = None
    if resident:
        # Constant block index -> the weight never changes across grid steps;
        # single-buffer it so the second VMEM copy goes to bigger row tiles.
        try:
            out = jax.block_until_ready(
                run(pl.BlockSpec((k, tn), lambda i, j: (0, j),
                                 pipeline_mode=pl.Buffered(1))))
        except Exception:
            out = None  # pipeline_mode unsupported -> default double-buffering
    if out is None:
        out = run(pl.BlockSpec((k, tn), lambda i, j: (0, j)))

    # N was padded to a lane multiple only for lane-dense stores / MXU feed;
    # the column slice is a no-op for typical GemNet widths (multiples of 128).
    return out if n_pad == out_features else out[:, :out_features]


# ----------------------------- reference + main --------------------------------

def dense_reference(x, weight, activation=None):
    y = x @ weight.T
    if activation in ("swish", "silu"):
        y = (y * jax.nn.sigmoid(y)) * (1.0 / 0.6)
    elif activation == "siqu":
        y = y * (y * jax.nn.sigmoid(y))
    return y


if __name__ == "__main__":
    key = jax.random.PRNGKey(0)
    k_x, k_w, k_x2 = jax.random.split(key, 3)

    in_features, out_features = 32, 64
    weight = he_orthogonal_init(k_w, (out_features, in_features))
    # bias=False in this Dense config; if bias existed it would be zeros anyway.

    # One-time weight layout prep (transpose + N-pad), outside the hot path.
    wt_f32 = prepare_weight(weight)

    # --- f32 path: all activation branches, exact vs reference ----------------
    x = jax.random.normal(k_x, (8, in_features), dtype=jnp.float32)
    for act in ("silu", "siqu", None):
        out = jax.block_until_ready(
            dense_forward(x, wt_f32, out_features, activation=act))
        ref = dense_reference(x, weight, activation=act)
        assert out.shape == (8, out_features)
        assert jnp.allclose(out, ref, atol=1e-5, rtol=1e-5)

    # --- ragged rows / multiple row tiles (masked last block) -----------------
    x2 = jax.random.normal(k_x2, (300, in_features), dtype=jnp.float32)
    out2 = jax.block_until_ready(
        dense_forward(x2, wt_f32, out_features, activation="silu"))
    ref2 = dense_reference(x2, weight, activation="silu")
    assert out2.shape == (300, out_features)
    assert jnp.allclose(out2, ref2, atol=1e-5, rtol=1e-5)

    # --- bf16 MXU-feed path: pre-cast outside the kernel, f32 accumulate ------
    wt_bf16 = prepare_weight(weight, compute_dtype=jnp.bfloat16)
    out_bf = jax.block_until_ready(
        dense_forward(x.astype(jnp.bfloat16), wt_bf16, out_features,
                      activation="silu", out_dtype=jnp.float32))
    ref_bf = dense_reference(x, weight, activation="silu")
    assert jnp.allclose(out_bf, ref_bf, atol=1e-1, rtol=5e-2)

    print("KERNEL_OK")
</pallas_src>

<mosaic_0001>
module attributes {stable_mosaic.version = 11 : i64} {
  func.func @_dense_kernel(%arg0: i32, %arg1: i32, %arg2: memref<8x32xf32, #tpu.memory_space<vmem>>, %arg3: memref<32x128xf32, #tpu.memory_space<vmem>>, %arg4: memref<8x128xf32, #tpu.memory_space<vmem>>) attributes {dimension_semantics = [#tpu.dimension_semantics<parallel>, #tpu.dimension_semantics<parallel>], iteration_bounds = array<i64: 1, 1>, scalar_prefetch = 0 : i64, scratch_operands = 0 : i64, tpu.core_type = #tpu.core_type<tc>, window_params = [{transform_indices = @transform_0, window_bounds = array<i64: 8, 32>}, {pipeline_mode = #tpu.pipeline_mode<synchronous>, transform_indices = @transform_1, window_bounds = array<i64: 32, 128>}, {transform_indices = @transform_2, window_bounds = array<i64: 8, 128>}]} {
    %c0 = arith.constant 0 : index
    %c0_0 = arith.constant 0 : index
    %0 = vector.load %arg2[%c0, %c0_0] : memref<8x32xf32, #tpu.memory_space<vmem>>, vector<8x32xf32>
    %c0_1 = arith.constant 0 : index
    %c0_2 = arith.constant 0 : index
    %1 = vector.load %arg3[%c0_1, %c0_2] : memref<32x128xf32, #tpu.memory_space<vmem>>, vector<32x128xf32>
    %cst = arith.constant dense<0.000000e+00> : vector<8x128xf32>
    %2 = tpu.matmul %0, %1, %cst {dimension_numbers = #tpu.dot_dimension_numbers<[1], [0], [0], [1], [0, 0, 1, 1], [], []>} : vector<8x32xf32>, vector<32x128xf32>, vector<8x128xf32> -> vector<8x128xf32>
    %3 = arith.negf %2 : vector<8x128xf32>
    %4 = math.exp %3 : vector<8x128xf32>
    %cst_3 = arith.constant 1.000000e+00 : f32
    %5 = vector.broadcast %cst_3 : f32 to vector<8x128xf32>
    %6 = arith.addf %5, %4 : vector<8x128xf32>
    %7 = arith.divf %5, %6 : vector<8x128xf32>
    %8 = arith.mulf %2, %7 : vector<8x128xf32>
    %cst_4 = arith.constant 1.66666663 : f32
    %9 = vector.broadcast %cst_4 : f32 to vector<8x128xf32>
    %10 = arith.mulf %8, %9 : vector<8x128xf32>
    %c0_5 = arith.constant 0 : index
    %c0_6 = arith.constant 0 : index
    %11 = vector.load %arg4[%c0_5, %c0_6] : memref<8x128xf32, #tpu.memory_space<vmem>>, vector<8x128xf32>
    tpu.vector_store %arg4[%c0_5, %c0_6], %10 {strides = array<i32>} : memref<8x128xf32, #tpu.memory_space<vmem>>, vector<8x128xf32>,
    return
  }
  func.func @transform_0(%arg0: i32, %arg1: i32) -> (i32, i32) {
    %c0_i32 = arith.constant 0 : i32
    %c0_i32_0 = arith.constant 0 : i32
    return %arg0, %c0_i32 : i32, i32
  }
  func.func @transform_1(%arg0: i32, %arg1: i32) -> (i32, i32) {
    %c0_i32 = arith.constant 0 : i32
    %c0_i32_0 = arith.constant 0 : i32
    return %c0_i32, %arg1 : i32, i32
  }
  func.func @transform_2(%arg0: i32, %arg1: i32) -> (i32, i32) {
    %c0_i32 = arith.constant 0 : i32
    return %arg0, %arg1 : i32, i32
  }
}

module attributes {stable_mosaic.version = 11 : i64} {
  func.func @_dense_kernel(%arg0: i32, %arg1: i32, %arg2: memref<8x32xf32, #tpu.memory_space<vmem>>, %arg3: memref<32x128xf32, #tpu.memory_space<vmem>>, %arg4: memref<8x128xf32, #tpu.memory_space<vmem>>) attributes {dimension_semantics = [#tpu.dimension_semantics<parallel>, #tpu.dimension_semantics<parallel>], iteration_bounds = array<i64: 1, 1>, scalar_prefetch = 0 : i64, scratch_operands = 0 : i64, tpu.core_type = #tpu.core_type<tc>, window_params = [{transform_indices = @transform_0, window_bounds = array<i64: 8, 32>}, {transform_indices = @transform_1, window_bounds = array<i64: 32, 128>}, {transform_indices = @transform_2, window_bounds = array<i64: 8, 128>}]} {
    %c0 = arith.constant 0 : index
    %c0_0 = arith.constant 0 : index
    %0 = vector.load %arg2[%c0, %c0_0] : memref<8x32xf32, #tpu.memory_space<vmem>>, vector<8x32xf32>
    %c0_1 = arith.constant 0 : index
    %c0_2 = arith.constant 0 : index
    %1 = vector.load %arg3[%c0_1, %c0_2] : memref<32x128xf32, #tpu.memory_space<vmem>>, vector<32x128xf32>
    %cst = arith.constant dense<0.000000e+00> : vector<8x128xf32>
    %2 = tpu.matmul %0, %1, %cst {dimension_numbers = #tpu.dot_dimension_numbers<[1], [0], [0], [1], [0, 0, 1, 1], [], []>} : vector<8x32xf32>, vector<32x128xf32>, vector<8x128xf32> -> vector<8x128xf32>
    %3 = arith.negf %2 : vector<8x128xf32>
    %4 = math.exp %3 : vector<8x128xf32>
    %cst_3 = arith.constant 1.000000e+00 : f32
    %5 = vector.broadcast %cst_3 : f32 to vector<8x128xf32>
    %6 = arith.addf %5, %4 : vector<8x128xf32>
    %7 = arith.divf %5, %6 : vector<8x128xf32>
    %8 = arith.mulf %2, %7 : vector<8x128xf32>
    %cst_4 = arith.constant 1.66666663 : f32
    %9 = vector.broadcast %cst_4 : f32 to vector<8x128xf32>
    %10 = arith.mulf %8, %9 : vector<8x128xf32>
    %c0_5 = arith.constant 0 : index
    %c0_6 = arith.constant 0 : index
    %11 = vector.load %arg4[%c0_5, %c0_6] : memref<8x128xf32, #tpu.memory_space<vmem>>, vector<8x128xf32>
    tpu.vector_store %arg4[%c0_5, %c0_6], %10 {strides = array<i32>} : memref<8x128xf32, #tpu.memory_space<vmem>>, vector<8x128xf32>,
    return
  }
  func.func @transform_0(%arg0: i32, %arg1: i32) -> (i32, i32) {
    %c0_i32 = arith.constant 0 : i32
    %c0_i32_0 = arith.constant 0 : i32
    return %arg0, %c0_i32 : i32, i32
  }
  func.func @transform_1(%arg0: i32, %arg1: i32) -> (i32, i32) {
    %c0_i32 = arith.constant 0 : i32
    %c0_i32_0 = arith.constant 0 : i32
    return %c0_i32, %arg1 : i32, i32
  }
  func.func @transform_2(%arg0: i32, %arg1: i32) -> (i32, i32) {
    %c0_i32 = arith.constant 0 : i32
    return %arg0, %arg1 : i32, i32
  }
}

</mosaic_0001>

<bundles_post_ra>
// kernel: tpu_custom_call.1
= control target key start
LH: loop header
LB: loop body
LE: loop exit
PB: predicated region body
PF: predicated region fallthrough
CT: control target
= control target key end

     0   :  { %7 = vsyncpa [#allocation3], 0  ;;  %s229_s0 = inlined_call_operand.hbm [shape: f32[8,32], index: 0, kind: input, shape index: {}]   ;;  %s230_s1 = inlined_call_operand.hbm [shape: f32[32,128], index: 1, kind: input, shape index: {}]   ;;  %s231_s2 = inlined_call_operand.hbm [shape: f32[8,128], index: 2, kind: output, shape index: {}]  }
   0x1   :  { %8 = vsyncpa [#allocation6], 0 }
   0x2   :  { %9 = vsyncpa [#allocation4], 0  ;;  %s15_s11 = sshll.u32 %s229_s0, 4  ;;  %s200_s12 = smov [#allocation2]   ;;  %s16_s11 = int_to_ptr.hbm [resolvable:$true] %s15_s11 }
   0x3   :  { %s17_s13 = sshll.u32 %s200_s12, 4  ;;  %s25_s16 = sshll.u32 %s230_s1, 4  ;;  %s18_s13 = int_to_ptr.vmem [resolvable:$true] %s17_s13  ;;  %s26_s16 = int_to_ptr.hbm [resolvable:$true] %s25_s16 }
   0x4   :  { %20 = dma.hbm_to_vmem [thread:$0]  %s16_s11, 128, %s18_s13, [#allocation3]  }
   0x5   :  { %s201_s17 = smov [#allocation5]   ;;  %s202_s19 = smov 128  }
   0x6   :  { %s27_s18 = sshll.u32 %s201_s17, 4  ;;  %s203_s20 = smov 8   ;;  %s28_s18 = int_to_ptr.vmem [resolvable:$true] %s27_s18 }
   0x7   :  { %33 = dma.hbm_to_vmem [thread:$0]  %s26_s16, 512, %s28_s18, [#allocation6], %s202_s19, %s202_s19, %s203_s20  }
   0x8   :  { %194 = dma.done.wait [#allocation3], 128  }
   0x9   :  { %195 = vsyncadd [#allocation3], 4294967168 }
   0xa   :  { %196 = dma.done.wait [#allocation6], 512  }
   0xb   :  { %197 = vsyncadd [#allocation6], 4294966784  ;;  %v46_v0 = vld [vmem:[#allocation5 + $0x18] sm:$0xff]  ;;  %v45_v1 = vld [vmem:[#allocation5 + $0x10] sm:$0xff]  ;;  %vm47_vm0 = vcmask 261120   ;;  %s204_s0 = smov [#allocation7]  }
   0xc   :  { %63 = vmatpush.msra.mxu0 %v46_v0  ;;  %v44_v2 = vld [vmem:[#allocation5 + $0x8] sm:$0xff]  ;;  %v43_v3 = vld [vmem:[#allocation5] sm:$0xff]  ;;  %v42_v4 = vld [vmem:[#allocation2] sm:$0xff]  ;;  %s98_s1 = sshll.u32 %s204_s0, 4  ;;  %s100_s23 = sshll.u32 %s231_s2, 4  ;;  %s99_s1 = int_to_ptr.vmem [resolvable:$true] %s98_s1  ;;  %s101_s23 = int_to_ptr.hbm [resolvable:$true] %s100_s23 }
   0xe   :  { %64 = vmatpush.msra.mxu0 %v45_v1 }
  0x10   :  { %65 = vmatpush.msra.mxu0 %v44_v2 }
  0x12   :  { %66 = vmatpush.msra.mxu0 %v43_v3 }
  0x13   :  { %111 = vmatmul.msk.f32.vlgmr.msra.gmra.mxu0 %vm47_vm0, %v42_v4 }
  0x90   :  { %v68_v5 = vpop.f32.mrf.mxu0 }
  0x91   :  { %v112_v6 = vmul.f32 -1.442695, %v68_v5 }
  0x93   :  { %118 = vpow2.f32 %v112_v6 }
  0x99   :  { %v119_v7 = vpop.eup %118 }
  0x9a   :  { %v74_v8 = vadd.f32 1.0, %v119_v7 }
  0x9c   :  { %120 = vrcp.f32 %v74_v8  ;;  %v86_v12 = vand.u32 2147483648, %v74_v8  ;;  %v84_v14 = vand.u32 2147483647, %v74_v8  ;;  %vm80_vm2 = vweird.f32 %v74_v8 }
  0x9e   :  { %v87_v16 = vor.u32 1.1754944e-38, %v86_v12  ;;  %vm85_vm4 = vcmp.eq.f32.partialorder %v84_v14, 8.507059e+37 }
  0xa2   :  { %v121_v9 = vpop.eup %120 }
  0xa3   :  { %v76_v10 = vmul.f32 %v121_v9, %v74_v8  ;;  %vm81_vm1 = vweird.f32 %v121_v9 }
  0xa4   :  { %vm82_vm3 = vmor %vm80_vm2, %vm81_vm1 }
  0xa5   :  { %v77_v11 = vsub.f32 1.0, %v76_v10 }
  0xa7   :  { %v78_v13 = vmul.f32 %v121_v9, %v77_v11 }
  0xa9   :  { %v79_v15 = vadd.f32 %v121_v9, %v78_v13 }
  0xab   :  { %v83_v17 = vsel %vm82_vm3, %v121_v9, %v79_v15 }
  0xac   :  { %v88_v18 = vsel %vm85_vm4, %v87_v16, %v83_v17 }
  0xad   :  { %v90_v19 = vmul.f32 %v88_v18, %v68_v5 }
  0xaf   :  { %v91_v20 = vmul.f32 1.6666666, %v90_v19 }
  0xb1   :  { %92 = vst [vmem:[#allocation7] sm:$0xff] %v91_v20 }
  0xb2   :  { %103 = dma.vmem_to_hbm [thread:$0]  %s99_s1, 128, %s101_s23, [#allocation4]  }
  0xb3   :  { %198 = dma.done.wait [#allocation4], 128  }
  0xb4   :  { %199 = vsyncadd [#allocation4], 4294967168 }
  0xb5   :  { %108 = vsyncpa [#allocation3], 1 }
  0xb6   :  { %109 = vsyncpa [#allocation6], 1 }
  0xb7   :  { %110 = vsyncpa [#allocation4], 1 }

// kernel: tpu_custom_call.1
= control target key start
LH: loop header
LB: loop body
LE: loop exit
PB: predicated region body
PF: predicated region fallthrough
CT: control target
= control target key end

     0   :  { %7 = vsyncpa [#allocation3], 0  ;;  %s229_s0 = inlined_call_operand.hbm [shape: f32[8,32], index: 0, kind: input, shape index: {}]   ;;  %s230_s1 = inlined_call_operand.hbm [shape: f32[32,128], index: 1, kind: input, shape index: {}]   ;;  %s231_s2 = inlined_call_operand.hbm [shape: f32[8,128], index: 2, kind: output, shape index: {}]  }
   0x1   :  { %8 = vsyncpa [#allocation6], 0 }
   0x2   :  { %9 = vsyncpa [#allocation4], 0  ;;  %s15_s11 = sshll.u32 %s229_s0, 4  ;;  %s200_s12 = smov [#allocation2]   ;;  %s16_s11 = int_to_ptr.hbm [resolvable:$true] %s15_s11 }
   0x3   :  { %s17_s13 = sshll.u32 %s200_s12, 4  ;;  %s25_s16 = sshll.u32 %s230_s1, 4  ;;  %s18_s13 = int_to_ptr.vmem [resolvable:$true] %s17_s13  ;;  %s26_s16 = int_to_ptr.hbm [resolvable:$true] %s25_s16 }
   0x4   :  { %20 = dma.hbm_to_vmem [thread:$0]  %s16_s11, 128, %s18_s13, [#allocation3]  }
   0x5   :  { %s201_s17 = smov [#allocation5]   ;;  %s202_s19 = smov 128  }
   0x6   :  { %s27_s18 = sshll.u32 %s201_s17, 4  ;;  %s203_s20 = smov 8   ;;  %s28_s18 = int_to_ptr.vmem [resolvable:$true] %s27_s18 }
   0x7   :  { %33 = dma.hbm_to_vmem [thread:$0]  %s26_s16, 512, %s28_s18, [#allocation6], %s202_s19, %s202_s19, %s203_s20  }
   0x8   :  { %194 = dma.done.wait [#allocation3], 128  }
   0x9   :  { %195 = vsyncadd [#allocation3], 4294967168 }
   0xa   :  { %196 = dma.done.wait [#allocation6], 512  }
   0xb   :  { %197 = vsyncadd [#allocation6], 4294966784  ;;  %v46_v0 = vld [vmem:[#allocation5 + $0x18] sm:$0xff]  ;;  %v45_v1 = vld [vmem:[#allocation5 + $0x10] sm:$0xff]  ;;  %vm47_vm0 = vcmask 261120   ;;  %s204_s0 = smov [#allocation7]  }
   0xc   :  { %63 = vmatpush.msra.mxu0 %v46_v0  ;;  %v44_v2 = vld [vmem:[#allocation5 + $0x8] sm:$0xff]  ;;  %v43_v3 = vld [vmem:[#allocation5] sm:$0xff]  ;;  %v42_v4 = vld [vmem:[#allocation2] sm:$0xff]  ;;  %s98_s1 = sshll.u32 %s204_s0, 4  ;;  %s100_s23 = sshll.u32 %s231_s2, 4  ;;  %s99_s1 = int_to_ptr.vmem [resolvable:$true] %s98_s1  ;;  %s101_s23 = int_to_ptr.hbm [resolvable:$true] %s100_s23 }
   0xe   :  { %64 = vmatpush.msra.mxu0 %v45_v1 }
  0x10   :  { %65 = vmatpush.msra.mxu0 %v44_v2 }
  0x12   :  { %66 = vmatpush.msra.mxu0 %v43_v3 }
  0x13   :  { %111 = vmatmul.msk.f32.vlgmr.msra.gmra.mxu0 %vm47_vm0, %v42_v4 }
  0x90   :  { %v68_v5 = vpop.f32.mrf.mxu0 }
  0x91   :  { %v112_v6 = vmul.f32 -1.442695, %v68_v5 }
  0x93   :  { %118 = vpow2.f32 %v112_v6 }
  0x99   :  { %v119_v7 = vpop.eup %118 }
  0x9a   :  { %v74_v8 = vadd.f32 1.0, %v119_v7 }
  0x9c   :  { %120 = vrcp.f32 %v74_v8  ;;  %v86_v12 = vand.u32 2147483648, %v74_v8  ;;  %v84_v14 = vand.u32 2147483647, %v74_v8  ;;  %vm80_vm2 = vweird.f32 %v74_v8 }
  0x9e   :  { %v87_v16 = vor.u32 1.1754944e-38, %v86_v12  ;;  %vm85_vm4 = vcmp.eq.f32.partialorder %v84_v14, 8.507059e+37 }
  0xa2   :  { %v121_v9 = vpop.eup %120 }
  0xa3   :  { %v76_v10 = vmul.f32 %v121_v9, %v74_v8  ;;  %vm81_vm1 = vweird.f32 %v121_v9 }
  0xa4   :  { %vm82_vm3 = vmor %vm80_vm2, %vm81_vm1 }
  0xa5   :  { %v77_v11 = vsub.f32 1.0, %v76_v10 }
  0xa7   :  { %v78_v13 = vmul.f32 %v121_v9, %v77_v11 }
  0xa9   :  { %v79_v15 = vadd.f32 %v121_v9, %v78_v13 }
  0xab   :  { %v83_v17 = vsel %vm82_vm3, %v121_v9, %v79_v15 }
  0xac   :  { %v88_v18 = vsel %vm85_vm4, %v87_v16, %v83_v17 }
  0xad   :  { %v90_v19 = vmul.f32 %v88_v18, %v68_v5 }
  0xaf   :  { %v91_v20 = vmul.f32 1.6666666, %v90_v19 }
  0xb1   :  { %92 = vst [vmem:[#allocation7] sm:$0xff] %v91_v20 }
  0xb2   :  { %103 = dma.vmem_to_hbm [thread:$0]  %s99_s1, 128, %s101_s23, [#allocation4]  }
  0xb3   :  { %198 = dma.done.wait [#allocation4], 128  }
  0xb4   :  { %199 = vsyncadd [#allocation4], 4294967168 }
  0xb5   :  { %108 = vsyncpa [#allocation3], 1 }
  0xb6   :  { %109 = vsyncpa [#allocation6], 1 }
  0xb7   :  { %110 = vsyncpa [#allocation4], 1 }

</bundles_post_ra>
